<compile_context>
chip_gen: v7x
topology: tpu7x:2x2x1
jax: 0.10.0
libtpu: 0.0.40
codegen_flags: <defaults>
</compile_context>

<pallas_src>
import math

import jax
import jax.numpy as jnp
from jax.experimental import pallas as pl
from jax.experimental.pallas import tpu as pltpu

_LANES = 128  # TPU vreg lane width; last dim of every block.


# ----------------------------------------------------------------------------
# Init-time glue: build the sinusoidal PE buffer exactly as the PyTorch
# module's __init__ does.  Runs once; plain JAX, no Pallas needed.
# ----------------------------------------------------------------------------
def build_sine_pe(dim, temperature, max_shape, normalize):
    dim_t = jnp.arange(dim // 2, dtype=jnp.float32)
    # torch: temperature ** (2 * (dim_t // 2) / dim)   (floor-div, /dim)
    dim_t = temperature ** (2.0 * jnp.floor(dim_t / 2.0) / dim)

    ones = jnp.ones(max_shape, dtype=jnp.float32)
    x_embed = jnp.cumsum(ones, axis=1)[None]  # (1, H, W)
    y_embed = jnp.cumsum(ones, axis=0)[None]  # (1, H, W)

    if normalize:
        eps = 1e-06
        scale = 2.0 * math.pi
        y_embed = y_embed / (y_embed[:, -1:, :] + eps) * scale
        x_embed = x_embed / (x_embed[:, :, -1:] + eps) * scale

    pos_x = x_embed[:, :, :, None] / dim_t  # (1, H, W, dim//2)
    pos_y = y_embed[:, :, :, None] / dim_t  # (1, H, W, dim//2)

    def interleave_sin_cos(p):
        s = jnp.sin(p[:, :, :, 0::2])
        c = jnp.cos(p[:, :, :, 1::2])
        stacked = jnp.stack((s, c), axis=4)  # (1, H, W, dim//4, 2)
        return stacked.reshape(stacked.shape[0], stacked.shape[1],
                               stacked.shape[2], -1)  # (1, H, W, dim//2)

    pos_x = interleave_sin_cos(pos_x)
    pos_y = interleave_sin_cos(pos_y)

    pos = jnp.concatenate((pos_y, pos_x), axis=3)  # (1, H, W, dim)
    pos = jnp.transpose(pos, (0, 3, 1, 2))         # (1, dim, H, W)
    return pos.astype(jnp.float32)


def prepare_pe(pe, H, W):
    """Init-time: crop the PE buffer to the actual feature-map size and flatten
    it into the lane-dense layout used by the kernel.  Done ONCE, off the
    forward hot path."""
    _, C, max_H, max_W = pe.shape
    assert H <= max_H and W <= max_W, "feature map larger than max_shape"
    pe_c = pe[:, :, :H, :W]  # (1, C, H, W), materialized once
    N = C * H * W
    if N % _LANES == 0:
        return pe_c.reshape(1, N // _LANES, _LANES)  # lane-dense (1, M, 128)
    return pe_c.reshape(1, N)                        # fallback flat (1, N)


# ----------------------------------------------------------------------------
# Pallas kernel: out = x + pe  (identical block shapes, no broadcast needed)
# ----------------------------------------------------------------------------
def _add_pe_kernel(x_ref, pe_ref, o_ref):
    o_ref[...] = x_ref[...] + pe_ref[...]


def _round_up(v, m):
    return ((v + m - 1) // m) * m


def _pick_tile_m(M, target=4096):
    """Row tile for the (B, M, 128) lane-dense path.
    - target=4096 rows -> 2 MiB f32 blocks (~12 MiB double-buffered total),
      big enough to amortize per-step overhead, small enough for v5e's 16 MiB
      scoped-VMEM default.
    - If the whole array fits in <= 2 target tiles, split into exactly 2 tiles
      (multiple of 8) so the parallel m axis can feed both v7x TensorCores.
    - Tail blocks are masked by Pallas (cdiv grid), so no divisibility needed."""
    if M <= 8:
        return M  # full extent is always a legal block shape
    if M <= 2 * target:
        return _round_up(pl.cdiv(M, 2), 8)
    return target


def _pick_tile_n(N, target=4096 * _LANES):
    """Lane tile for the (B, N) fallback path (multiple of 128, masked tail)."""
    if N <= _LANES:
        return N  # full extent is always a legal block shape
    if N <= 2 * target:
        return _round_up(pl.cdiv(N, 2), _LANES)
    return target


def position_embedding_sine_forward(x, pe_prepared):
    """x: (B, C, H, W) float32.
    pe_prepared: output of prepare_pe — (1, M, 128) lane-dense (preferred) or
    (1, N) flat fallback when C*H*W is not a multiple of 128."""
    B, C, H, W = x.shape
    N = C * H * W

    # Pure-bandwidth op: 1 add/elem, read x + read pe + write out.
    cost = pl.CostEstimate(flops=B * N, transcendentals=0,
                           bytes_accessed=(2 * B + 1) * N * 4)

    if N % _LANES != 0:
        # ---- Fallback: flat (B, N) layout, lane-dense except one masked tail.
        assert pe_prepared.shape == (1, N)
        x_flat = x.reshape(B, N)  # free reshape (NCHW contiguous)
        tile_n = _pick_tile_n(N)
        out = pl.pallas_call(
            _add_pe_kernel,
            out_shape=jax.ShapeDtypeStruct((B, N), x.dtype),
            grid_spec=pl.GridSpec(
                grid=(pl.cdiv(N, tile_n), B),
                in_specs=[
                    pl.BlockSpec((1, tile_n), lambda n, b: (b, n)),
                    pl.BlockSpec((1, tile_n), lambda n, b: (0, n)),
                ],
                out_specs=pl.BlockSpec((1, tile_n), lambda n, b: (b, n)),
            ),
            input_output_aliases={0: 0},
            compiler_params=pltpu.CompilerParams(
                dimension_semantics=("parallel", "parallel")),
            cost_estimate=cost,
        )(x_flat, pe_prepared)
        return out.reshape(B, C, H, W)

    # ---- Lane-dense path (B, M, 128) -------------------------------------
    M = N // _LANES
    assert pe_prepared.shape == (1, M, _LANES)
    tile_m = _pick_tile_m(M)

    x_flat = x.reshape(B, M, _LANES)  # free reshape (NCHW contiguous)

    out_flat = pl.pallas_call(
        _add_pe_kernel,
        out_shape=jax.ShapeDtypeStruct((B, M, _LANES), x.dtype),
        grid_spec=pl.GridSpec(
            # Row-tile axis outermost; both axes independent & disjoint, so
            # both are "parallel" (v7x megacore never idles even when the
            # m axis has a single tile).  pe's index_map ignores b.
            grid=(pl.cdiv(M, tile_m), B),
            in_specs=[
                pl.BlockSpec((1, tile_m, _LANES), lambda m, b: (b, m, 0)),
                pl.BlockSpec((1, tile_m, _LANES), lambda m, b: (0, m, 0)),
            ],
            out_specs=pl.BlockSpec((1, tile_m, _LANES), lambda m, b: (b, m, 0)),
        ),
        input_output_aliases={0: 0},  # write in place over donated x
        compiler_params=pltpu.CompilerParams(
            dimension_semantics=("parallel", "parallel")),
        cost_estimate=cost,
    )(x_flat, pe_prepared)

    return out_flat.reshape(B, C, H, W)


# ----------------------------------------------------------------------------
# Pure-JAX reference for correctness checking.
# ----------------------------------------------------------------------------
def position_embedding_sine_ref(x, pe):
    _, _, H, W = x.shape
    return x + pe[:, :, :H, :W]


if __name__ == "__main__":
    key = jax.random.PRNGKey(0)
    k1, k2 = jax.random.split(key)

    fwd = jax.jit(position_embedding_sine_forward, donate_argnums=(0,))

    # ---- Test 1: lane-dense path (C*H*W % 128 == 0) ------------------------
    config = {"dim": 32, "temperature": 10000.0, "max_shape": (32, 32),
              "normalize": True}
    B, C, H, W = 2, config["dim"], 16, 16

    pe = build_sine_pe(config["dim"], config["temperature"],
                       config["max_shape"], config["normalize"])
    pe_prepared = prepare_pe(pe, H, W)  # crop + lane-dense flatten, once

    x = jax.random.normal(k1, (B, C, H, W), dtype=jnp.float32)
    ref = position_embedding_sine_ref(x, pe)  # computed BEFORE donation

    out = jax.block_until_ready(fwd(x, pe_prepared))
    assert out.shape == (B, C, H, W)
    assert out.dtype == jnp.float32
    assert jnp.allclose(out, ref, atol=1e-6, rtol=1e-6)

    # ---- Test 2: fallback path (C*H*W % 128 != 0) --------------------------
    config2 = {"dim": 4, "temperature": 10000.0, "max_shape": (16, 16),
               "normalize": True}
    B2, C2, H2, W2 = 2, config2["dim"], 9, 9  # N = 324, not a multiple of 128

    pe2 = build_sine_pe(config2["dim"], config2["temperature"],
                        config2["max_shape"], config2["normalize"])
    pe2_prepared = prepare_pe(pe2, H2, W2)

    x2 = jax.random.normal(k2, (B2, C2, H2, W2), dtype=jnp.float32)
    ref2 = position_embedding_sine_ref(x2, pe2)

    out2 = jax.block_until_ready(fwd(x2, pe2_prepared))
    assert out2.shape == (B2, C2, H2, W2)
    assert jnp.allclose(out2, ref2, atol=1e-6, rtol=1e-6)

    print("KERNEL_OK")
</pallas_src>

<mosaic_0001>
module attributes {stable_mosaic.version = 11 : i64} {
  func.func @_add_pe_kernel(%arg0: i32, %arg1: i32, %arg2: memref<1x32x128xf32, #tpu.memory_space<vmem>>, %arg3: memref<1x32x128xf32, #tpu.memory_space<vmem>>, %arg4: memref<1x32x128xf32, #tpu.memory_space<vmem>>) attributes {dimension_semantics = [#tpu.dimension_semantics<parallel>, #tpu.dimension_semantics<parallel>], iteration_bounds = array<i64: 2, 2>, scalar_prefetch = 0 : i64, scratch_operands = 0 : i64, tpu.core_type = #tpu.core_type<tc>, window_params = [{transform_indices = @transform_0, window_bounds = array<i64: 1, 32, 128>}, {transform_indices = @transform_1, window_bounds = array<i64: 1, 32, 128>}, {transform_indices = @transform_2, window_bounds = array<i64: 1, 32, 128>}]} {
    %c0 = arith.constant 0 : index
    %c0_0 = arith.constant 0 : index
    %c0_1 = arith.constant 0 : index
    %0 = vector.load %arg2[%c0, %c0_0, %c0_1] : memref<1x32x128xf32, #tpu.memory_space<vmem>>, vector<1x32x128xf32>
    %c0_2 = arith.constant 0 : index
    %c0_3 = arith.constant 0 : index
    %c0_4 = arith.constant 0 : index
    %1 = vector.load %arg3[%c0_2, %c0_3, %c0_4] : memref<1x32x128xf32, #tpu.memory_space<vmem>>, vector<1x32x128xf32>
    %2 = arith.addf %0, %1 : vector<1x32x128xf32>
    %c0_5 = arith.constant 0 : index
    %c0_6 = arith.constant 0 : index
    %c0_7 = arith.constant 0 : index
    %3 = vector.load %arg4[%c0_5, %c0_6, %c0_7] : memref<1x32x128xf32, #tpu.memory_space<vmem>>, vector<1x32x128xf32>
    tpu.vector_store %arg4[%c0_5, %c0_6, %c0_7], %2 {strides = array<i32>} : memref<1x32x128xf32, #tpu.memory_space<vmem>>, vector<1x32x128xf32>,
    return
  }
  func.func @transform_0(%arg0: i32, %arg1: i32) -> (i32, i32, i32) {
    %c0_i32 = arith.constant 0 : i32
    %c0_i32_0 = arith.constant 0 : i32
    return %arg1, %arg0, %c0_i32 : i32, i32, i32
  }
  func.func @transform_1(%arg0: i32, %arg1: i32) -> (i32, i32, i32) {
    %c0_i32 = arith.constant 0 : i32
    %c0_i32_0 = arith.constant 0 : i32
    %c0_i32_1 = arith.constant 0 : i32
    return %c0_i32, %arg0, %c0_i32_0 : i32, i32, i32
  }
  func.func @transform_2(%arg0: i32, %arg1: i32) -> (i32, i32, i32) {
    %c0_i32 = arith.constant 0 : i32
    %c0_i32_0 = arith.constant 0 : i32
    return %arg1, %arg0, %c0_i32 : i32, i32, i32
  }
}

</mosaic_0001>

<bundles_post_ra>
// kernel: position_embedding_sine_forward.1
= control target key start
LH: loop header
LB: loop body
LE: loop exit
PB: predicated region body
PF: predicated region fallthrough
CT: control target
= control target key end

     0   :  { %s433_s9 = smov 0   ;;  %s435_s10 = smov 0   ;;  %s487_s0 = inlined_call_operand.vmem [shape: f32[2,64,128], index: 0, kind: input, shape index: {}, may-alias: {0,2}]   ;;  %s488_s1 = inlined_call_operand.vmem [shape: f32[1,64,128], index: 1, kind: input, shape index: {}]   ;;  %s489_s2 = inlined_call_operand.vmem [shape: f32[2,64,128], index: 2, kind: output, shape index: {}, may-alias: {0,2}]  }
   0x1   :  { %s437_s11 = smov 0   ;;  %s439_s12 = smov 0  }
   0x2   :  { %s441_s13 = smov 0  }
   0x3 LB: > { %s21_s14 = sadd.s32 1, %s408_s11  ;;  %s24_s15 = sadd.s32 1, %s412_s12  ;;  %s416_s13 = sphi %s441_s13, %s12_s13   ;;  %s412_s12 = sphi %s439_s12, %s493_s12   ;;  %s408_s11 = sphi %s437_s11, %s492_s11   ;;  %s404_s10 = sphi %s435_s10, %s491_s10   ;;  %s400_s9 = sphi %s433_s9, %s490_s9  }
   0x4   : > { %p22_p0 = scmp.ge.s32.totalorder %s21_s14, 2  ;;  %p327_p1 = scmp.ge.s32.totalorder %s416_s13, 1 }
   0x5   : > { %p144_p2 = scmp.lt.s32.totalorder %s416_s13, 5 }
   0x6   : > { %s495_s14 = smov (%p22_p0, %s21_s14), 0  ;;  %s497_s15 = smov (!%p22_p0, %s24_s15), %s412_s12 }
   0x7   : > { %p145_p3 = pnand %p327_p1, %p144_p2  ;;  %p26_p4 = scmp.ge.s32.totalorder %s497_s15, 2 }
   0x8   : > { %s328_s16 = sshll.u32 (!%p145_p3), %s404_s10, 2  ;;  %p180_p5 = scmp.lt.s32.totalorder (!%p145_p3), %s400_s9, 1 }
   0x9   : > { %s499_s15 = smov (%p26_p4, %s497_s15), 0  ;;  %148 = sbr.rel (%p145_p3) target bundleno = 26 (0x1a), region = 28 }
   0xa   : > { %p182_p6 = scmp.lt.s32.totalorder (!%p145_p3), %s328_s16, 7 }
  0x10   : > { %s501_s9 = smov (!%p180_p5, %s400_s9), 1  ;;  %s503_s16 = smov (!%p182_p6, %s328_s16), 7 }
  0x11   : > { %s329_s17 = sshll.u32 %s501_s9, 3  ;;  %s332_s19 = sshll.u32 %s503_s16, 3 }
  0x12   : > { %s185_s18 = sadd.s32 %s329_s17, %s503_s16  ;;  %s193_s23 = scalar_lea.vmem %s488_s1, %s332_s19 }
  0x13   : > { %s330_s20 = sshll.u32 %s185_s18, 3  ;;  %v209_v0 = vld [vmem:[%s193_s23] sm:$0xff]  ;;  %v210_v1 = vld [vmem:[%s193_s23 + $0x8] sm:$0xff]  ;;  %v211_v2 = vld [vmem:[%s193_s23 + $0x10] sm:$0xff] }
  0x14   : > { %s187_s26 = scalar_lea.vmem %s487_s0, %s330_s20  ;;  %s203_s29 = scalar_lea.vmem %s489_s2, %s330_s20  ;;  %v212_v7 = vld [vmem:[%s193_s23 + $0x18] sm:$0xff] }
  0x15   : > { %v205_v3 = vld [vmem:[%s187_s26] sm:$0xff]  ;;  %v206_v4 = vld [vmem:[%s187_s26 + $0x8] sm:$0xff]  ;;  %v207_v5 = vld [vmem:[%s187_s26 + $0x10] sm:$0xff] }
  0x16   : > { %v208_v6 = vld [vmem:[%s187_s26 + $0x18] sm:$0xff]  ;;  %v213_v8 = vadd.f32 %v209_v0, %v205_v3  ;;  %v214_v9 = vadd.f32 %v210_v1, %v206_v4  ;;  %v215_v10 = vadd.f32 %v211_v2, %v207_v5 }
  0x17   : > { %v216_v11 = vadd.f32 %v212_v7, %v208_v6 }
  0x18   : > { %217 = vst [vmem:[%s203_s29] sm:$0xff] %v213_v8  ;;  %218 = vst [vmem:[%s203_s29 + $0x8] sm:$0xff] %v214_v9 }
  0x19   : > { %219 = vst [vmem:[%s203_s29 + $0x10] sm:$0xff] %v215_v10  ;;  %220 = vst [vmem:[%s203_s29 + $0x18] sm:$0xff] %v216_v11 }
  0x1a PF: > { %s12_s13 = sadd.s32 1, %s416_s13   ;;  %s490_s9 = smov %s408_s11 }
  0x1b   : > { %p9_p7 = scmp.ge.s32.totalorder %s12_s13, 6   ;;  %s491_s10 = smov %s412_s12 }
  0x1c   : > { %s492_s11 = smov %s495_s14  ;;  %s493_s12 = smov %s499_s15 }
  0x1d   :  { %11 = sbr.rel (!%p9_p7) target bundleno = 3 (0x3), region = 61 }

</bundles_post_ra>
